<compile_context>
chip_gen: v5e
topology: v5e:2x2
jax: 0.10.0
libtpu: 0.0.40
codegen_flags: <defaults>
</compile_context>

<pallas_src>
import functools

import jax
import jax.numpy as jnp
from jax.experimental import pallas as pl
from jax.experimental.pallas import tpu as pltpu


def _msa_module_kernel(x_ref, wqkv_ref, bqkv_ref, wmap_ref, bmap_ref, o_ref,
                       *, n_heads, scale):
    # x_ref:    (B, S, D)          tokens, consumed in original layout
    # wqkv_ref: (D, 3*H*D)         pre-transposed, fused [q|k|v] per head, heads major
    # bqkv_ref: (1, 3*H*D)
    # wmap_ref: (S, H*S)           linear_map weight (PyTorch (out, in) layout, used as-is)
    # bmap_ref: (S, 1)
    # o_ref:    (B, S, D)
    B, S, D = x_ref.shape

    w_qkv = wqkv_ref[...]
    b_qkv = bqkv_ref[...]
    w_map = wmap_ref[...]
    b_map = bmap_ref[...]

    # Contract last dims of both operands: a @ b.T without an explicit transpose.
    dot_t = (((1,), (1,)), ((), ()))

    for b in range(B):                       # static unroll: whole problem is one grid step
        # One fused QKV projection for every head of this batch: (S, 3*H*D).
        qkv = jnp.dot(x_ref[b], w_qkv, preferred_element_type=jnp.float32) + b_qkv

        head_outs = []
        for h in range(n_heads):             # static unroll over heads
            base = 3 * D * h
            q = qkv[:, base + 0 * D: base + 1 * D]
            k = qkv[:, base + 1 * D: base + 2 * D]
            v = qkv[:, base + 2 * D: base + 3 * D]

            s = jax.lax.dot_general(q, k, dot_t,
                                    preferred_element_type=jnp.float32) * scale
            s = s - jnp.max(s, axis=-1, keepdims=True)
            p = jnp.exp(s)
            attn = p * pl.reciprocal(jnp.sum(p, axis=-1, keepdims=True), approx=True)
            head_outs.append(jnp.dot(attn, v, preferred_element_type=jnp.float32))

        # torch.flatten(concat, 0, 1): stack heads along the token axis -> (H*S, D).
        concat = jnp.concatenate(head_outs, axis=0)

        # Fused linear_map: out[b, t, c] = sum_j W_map[t, j] * concat[j, c] + b_map[t].
        o_ref[b] = (jnp.dot(w_map, concat, preferred_element_type=jnp.float32)
                    + b_map).astype(o_ref.dtype)


def msa_module_pallas(x, wq, wk, wv, bq, bk, bv, w_map, b_map, *, n_heads):
    """x: (B, n_tokens, token_dim). wq/wk/wv: (H, D, D) PyTorch (out,in). bq/bk/bv: (H, D).
    w_map: (n_tokens, H*n_tokens). b_map: (n_tokens,)."""
    B, S, D = x.shape
    H = n_heads

    # Pre-transpose (nn.Linear stores (out, in)) and fuse Q/K/V + all heads into one
    # (D, 3*H*D) weight; column layout per head h: [Wq[h].T | Wk[h].T | Wv[h].T].
    w_qkv = jnp.concatenate(
        [wq.transpose(0, 2, 1), wk.transpose(0, 2, 1), wv.transpose(0, 2, 1)],
        axis=-1)                                        # (H, D, 3*D)
    w_qkv = w_qkv.transpose(1, 0, 2).reshape(D, 3 * H * D)
    b_qkv = jnp.concatenate([bq, bk, bv], axis=-1).reshape(1, 3 * H * D)
    b_map2 = b_map.reshape(S, 1)

    scale = 1.0 / float((S - 1) ** 0.5)                 # module uses sqrt(n_tokens - 1)

    return pl.pallas_call(
        functools.partial(_msa_module_kernel, n_heads=H, scale=scale),
        out_shape=jax.ShapeDtypeStruct((B, S, D), jnp.float32),
        # Single grid point: every operand is a full-array VMEM block.
        in_specs=[pl.BlockSpec(memory_space=pltpu.MemorySpace.VMEM)] * 5,
        out_specs=pl.BlockSpec(memory_space=pltpu.MemorySpace.VMEM),
    )(x, w_qkv, b_qkv, w_map, b_map2)


def msa_module_reference(x, wq, wk, wv, bq, bk, bv, w_map, b_map, *, n_heads):
    """Pure-JAX reference mirroring the PyTorch loop semantics."""
    B, S, D = x.shape
    scale = 1.0 / ((S - 1) ** 0.5)
    outs = []
    for b in range(B):
        tok = x[b]
        heads = []
        for h in range(n_heads):
            q = tok @ wq[h].T + bq[h]
            k = tok @ wk[h].T + bk[h]
            v = tok @ wv[h].T + bv[h]
            attn = jax.nn.softmax((q @ k.T) * scale, axis=-1)
            heads.append(attn @ v)
        concat = jnp.concatenate(heads, axis=0)          # (H*S, D)
        res_t = concat.T @ w_map.T + b_map               # (D, S) == linear_map(transpose)
        outs.append(res_t.T[None])                       # back to (S, D)
    return jnp.concatenate(outs, axis=0)


if __name__ == "__main__":
    # Shapes consistent with the module: batch=2, n_tokens=8, token_dim=32, n_heads=2.
    B, S, D, H = 2, 8, 32, 2

    key = jax.random.PRNGKey(0)
    kx, kq, kk, kv, kbq, kbk, kbv, kwm, kbm = jax.random.split(key, 9)

    bound = 1.0 / (D ** 0.5)            # nn.Linear(token_dim, token_dim) init bound
    bound_map = 1.0 / ((H * S) ** 0.5)  # nn.Linear(H*n_tokens, n_tokens) init bound

    x = jax.random.normal(kx, (B, S, D), dtype=jnp.float32)
    wq = jax.random.uniform(kq, (H, D, D), jnp.float32, -bound, bound)
    wk = jax.random.uniform(kk, (H, D, D), jnp.float32, -bound, bound)
    wv = jax.random.uniform(kv, (H, D, D), jnp.float32, -bound, bound)
    bq = jax.random.uniform(kbq, (H, D), jnp.float32, -bound, bound)
    bk = jax.random.uniform(kbk, (H, D), jnp.float32, -bound, bound)
    bv = jax.random.uniform(kbv, (H, D), jnp.float32, -bound, bound)
    w_map = jax.random.uniform(kwm, (S, H * S), jnp.float32, -bound_map, bound_map)
    b_map = jax.random.uniform(kbm, (S,), jnp.float32, -bound_map, bound_map)

    out = msa_module_pallas(x, wq, wk, wv, bq, bk, bv, w_map, b_map, n_heads=H)
    out = jax.block_until_ready(out)

    ref = msa_module_reference(x, wq, wk, wv, bq, bk, bv, w_map, b_map, n_heads=H)
    assert out.shape == (B, S, D)
    # Tolerance accounts for the approx (EUP) reciprocal in the softmax denominator.
    max_err = float(jnp.max(jnp.abs(out - ref)))
    assert jnp.allclose(out, ref, atol=5e-3, rtol=5e-3), f"mismatch vs reference, max abs err={max_err}"

    print("KERNEL_OK")
</pallas_src>

<mosaic_0001>
module attributes {stable_mosaic.version = 11 : i64} {
  func.func @_msa_module_kernel(%arg0: memref<2x8x32xf32, #tpu.memory_space<vmem>>, %arg1: memref<32x192xf32, #tpu.memory_space<vmem>>, %arg2: memref<1x192xf32, #tpu.memory_space<vmem>>, %arg3: memref<8x16xf32, #tpu.memory_space<vmem>>, %arg4: memref<8x1xf32, #tpu.memory_space<vmem>>, %arg5: memref<2x8x32xf32, #tpu.memory_space<vmem>>) attributes {dimension_semantics = [], scalar_prefetch = 0 : i64, scratch_operands = 0 : i64, tpu.core_type = #tpu.core_type<tc>} {
    %c0 = arith.constant 0 : index
    %c0_0 = arith.constant 0 : index
    %0 = vector.load %arg1[%c0, %c0_0] : memref<32x192xf32, #tpu.memory_space<vmem>>, vector<32x192xf32>
    %c0_1 = arith.constant 0 : index
    %c0_2 = arith.constant 0 : index
    %1 = vector.load %arg2[%c0_1, %c0_2] : memref<1x192xf32, #tpu.memory_space<vmem>>, vector<1x192xf32>
    %c0_3 = arith.constant 0 : index
    %c0_4 = arith.constant 0 : index
    %2 = vector.load %arg3[%c0_3, %c0_4] : memref<8x16xf32, #tpu.memory_space<vmem>>, vector<8x16xf32>
    %c0_5 = arith.constant 0 : index
    %c0_6 = arith.constant 0 : index
    %3 = vector.load %arg4[%c0_5, %c0_6] : memref<8x1xf32, #tpu.memory_space<vmem>>, vector<8x1xf32>
    %c0_7 = arith.constant 0 : index
    %c0_8 = arith.constant 0 : index
    %c0_9 = arith.constant 0 : index
    %4 = vector.load %arg0[%c0_7, %c0_8, %c0_9] : memref<2x8x32xf32, #tpu.memory_space<vmem>>, vector<1x8x32xf32>
    %5 = vector.shape_cast %4 : vector<1x8x32xf32> to vector<8x32xf32>
    %cst = arith.constant dense<0.000000e+00> : vector<8x192xf32>
    %6 = tpu.matmul %5, %0, %cst {dimension_numbers = #tpu.dot_dimension_numbers<[1], [0], [0], [1], [0, 0, 1, 1], [], []>} : vector<8x32xf32>, vector<32x192xf32>, vector<8x192xf32> -> vector<8x192xf32>
    %7 = vector.broadcast %1 : vector<1x192xf32> to vector<8x192xf32>
    %8 = arith.addf %6, %7 : vector<8x192xf32>
    %9 = vector.extract_strided_slice %8 {offsets = [0, 0], sizes = [8, 32], strides = [1, 1]} : vector<8x192xf32> to vector<8x32xf32>
    %10 = vector.extract_strided_slice %8 {offsets = [0, 32], sizes = [8, 32], strides = [1, 1]} : vector<8x192xf32> to vector<8x32xf32>
    %11 = vector.extract_strided_slice %8 {offsets = [0, 64], sizes = [8, 32], strides = [1, 1]} : vector<8x192xf32> to vector<8x32xf32>
    %cst_10 = arith.constant dense<0.000000e+00> : vector<8x8xf32>
    %12 = tpu.matmul %9, %10, %cst_10 {dimension_numbers = #tpu.dot_dimension_numbers<[1], [1], [0], [0], [0, 0, 1, 0], [], []>} : vector<8x32xf32>, vector<8x32xf32>, vector<8x8xf32> -> vector<8x8xf32>
    %cst_11 = arith.constant 0.377964467 : f32
    %13 = vector.broadcast %cst_11 : f32 to vector<8x8xf32>
    %14 = arith.mulf %12, %13 : vector<8x8xf32>
    %cst_12 = arith.constant dense<0xFF800000> : vector<8xf32>
    %15 = vector.multi_reduction <maximumf>, %14, %cst_12 [1] : vector<8x8xf32> to vector<8xf32>
    %16 = vector.shape_cast %15 : vector<8xf32> to vector<8x1xf32>
    %17 = vector.broadcast %16 : vector<8x1xf32> to vector<8x8xf32>
    %18 = arith.subf %14, %17 : vector<8x8xf32>
    %19 = math.exp %18 : vector<8x8xf32>
    %cst_13 = arith.constant dense<0.000000e+00> : vector<8xf32>
    %20 = vector.multi_reduction <add>, %19, %cst_13 [1] : vector<8x8xf32> to vector<8xf32>
    %21 = vector.shape_cast %20 : vector<8xf32> to vector<8x1xf32>
    %22 = tpu.reciprocal %21 {approx = true} : vector<8x1xf32> -> vector<8x1xf32>
    %23 = vector.broadcast %22 : vector<8x1xf32> to vector<8x8xf32>
    %24 = arith.mulf %19, %23 : vector<8x8xf32>
    %cst_14 = arith.constant dense<0.000000e+00> : vector<8x32xf32>
    %25 = tpu.matmul %24, %11, %cst_14 {dimension_numbers = #tpu.dot_dimension_numbers<[1], [0], [0], [1], [0, 0, 1, 1], [], []>} : vector<8x8xf32>, vector<8x32xf32>, vector<8x32xf32> -> vector<8x32xf32>
    %26 = vector.extract_strided_slice %8 {offsets = [0, 96], sizes = [8, 32], strides = [1, 1]} : vector<8x192xf32> to vector<8x32xf32>
    %27 = vector.extract_strided_slice %8 {offsets = [0, 128], sizes = [8, 32], strides = [1, 1]} : vector<8x192xf32> to vector<8x32xf32>
    %28 = vector.extract_strided_slice %8 {offsets = [0, 160], sizes = [8, 32], strides = [1, 1]} : vector<8x192xf32> to vector<8x32xf32>
    %cst_15 = arith.constant dense<0.000000e+00> : vector<8x8xf32>
    %29 = tpu.matmul %26, %27, %cst_15 {dimension_numbers = #tpu.dot_dimension_numbers<[1], [1], [0], [0], [0, 0, 1, 0], [], []>} : vector<8x32xf32>, vector<8x32xf32>, vector<8x8xf32> -> vector<8x8xf32>
    %cst_16 = arith.constant 0.377964467 : f32
    %30 = vector.broadcast %cst_16 : f32 to vector<8x8xf32>
    %31 = arith.mulf %29, %30 : vector<8x8xf32>
    %cst_17 = arith.constant dense<0xFF800000> : vector<8xf32>
    %32 = vector.multi_reduction <maximumf>, %31, %cst_17 [1] : vector<8x8xf32> to vector<8xf32>
    %33 = vector.shape_cast %32 : vector<8xf32> to vector<8x1xf32>
    %34 = vector.broadcast %33 : vector<8x1xf32> to vector<8x8xf32>
    %35 = arith.subf %31, %34 : vector<8x8xf32>
    %36 = math.exp %35 : vector<8x8xf32>
    %cst_18 = arith.constant dense<0.000000e+00> : vector<8xf32>
    %37 = vector.multi_reduction <add>, %36, %cst_18 [1] : vector<8x8xf32> to vector<8xf32>
    %38 = vector.shape_cast %37 : vector<8xf32> to vector<8x1xf32>
    %39 = tpu.reciprocal %38 {approx = true} : vector<8x1xf32> -> vector<8x1xf32>
    %40 = vector.broadcast %39 : vector<8x1xf32> to vector<8x8xf32>
    %41 = arith.mulf %36, %40 : vector<8x8xf32>
    %cst_19 = arith.constant dense<0.000000e+00> : vector<8x32xf32>
    %42 = tpu.matmul %41, %28, %cst_19 {dimension_numbers = #tpu.dot_dimension_numbers<[1], [0], [0], [1], [0, 0, 1, 1], [], []>} : vector<8x8xf32>, vector<8x32xf32>, vector<8x32xf32> -> vector<8x32xf32>
    %43 = tpu.concatenate %25, %42 in 0 : vector<8x32xf32>, vector<8x32xf32> -> vector<16x32xf32>
    %cst_20 = arith.constant dense<0.000000e+00> : vector<8x32xf32>
    %44 = tpu.matmul %2, %43, %cst_20 {dimension_numbers = #tpu.dot_dimension_numbers<[1], [0], [0], [1], [0, 0, 1, 1], [], []>} : vector<8x16xf32>, vector<16x32xf32>, vector<8x32xf32> -> vector<8x32xf32>
    %45 = vector.broadcast %3 : vector<8x1xf32> to vector<8x32xf32>
    %46 = arith.addf %44, %45 : vector<8x32xf32>
    %c0_21 = arith.constant 0 : index
    %c0_22 = arith.constant 0 : index
    %c0_23 = arith.constant 0 : index
    %47 = vector.load %arg5[%c0_21, %c0_22, %c0_23] : memref<2x8x32xf32, #tpu.memory_space<vmem>>, vector<1x8x32xf32>
    %48 = vector.shape_cast %47 : vector<1x8x32xf32> to vector<8x32xf32>
    %49 = vector.shape_cast %46 : vector<8x32xf32> to vector<1x8x32xf32>
    tpu.vector_store %arg5[%c0_21, %c0_22, %c0_23], %49 {strides = array<i32>} : memref<2x8x32xf32, #tpu.memory_space<vmem>>, vector<1x8x32xf32>,
    %c1 = arith.constant 1 : index
    %c0_24 = arith.constant 0 : index
    %c0_25 = arith.constant 0 : index
    %50 = vector.load %arg0[%c1, %c0_24, %c0_25] : memref<2x8x32xf32, #tpu.memory_space<vmem>>, vector<1x8x32xf32>
    %51 = vector.shape_cast %50 : vector<1x8x32xf32> to vector<8x32xf32>
    %cst_26 = arith.constant dense<0.000000e+00> : vector<8x192xf32>
    %52 = tpu.matmul %51, %0, %cst_26 {dimension_numbers = #tpu.dot_dimension_numbers<[1], [0], [0], [1], [0, 0, 1, 1], [], []>} : vector<8x32xf32>, vector<32x192xf32>, vector<8x192xf32> -> vector<8x192xf32>
    %53 = vector.broadcast %1 : vector<1x192xf32> to vector<8x192xf32>
    %54 = arith.addf %52, %53 : vector<8x192xf32>
    %55 = vector.extract_strided_slice %54 {offsets = [0, 0], sizes = [8, 32], strides = [1, 1]} : vector<8x192xf32> to vector<8x32xf32>
    %56 = vector.extract_strided_slice %54 {offsets = [0, 32], sizes = [8, 32], strides = [1, 1]} : vector<8x192xf32> to vector<8x32xf32>
    %57 = vector.extract_strided_slice %54 {offsets = [0, 64], sizes = [8, 32], strides = [1, 1]} : vector<8x192xf32> to vector<8x32xf32>
    %cst_27 = arith.constant dense<0.000000e+00> : vector<8x8xf32>
    %58 = tpu.matmul %55, %56, %cst_27 {dimension_numbers = #tpu.dot_dimension_numbers<[1], [1], [0], [0], [0, 0, 1, 0], [], []>} : vector<8x32xf32>, vector<8x32xf32>, vector<8x8xf32> -> vector<8x8xf32>
    %cst_28 = arith.constant 0.377964467 : f32
    %59 = vector.broadcast %cst_28 : f32 to vector<8x8xf32>
    %60 = arith.mulf %58, %59 : vector<8x8xf32>
    %cst_29 = arith.constant dense<0xFF800000> : vector<8xf32>
    %61 = vector.multi_reduction <maximumf>, %60, %cst_29 [1] : vector<8x8xf32> to vector<8xf32>
    %62 = vector.shape_cast %61 : vector<8xf32> to vector<8x1xf32>
    %63 = vector.broadcast %62 : vector<8x1xf32> to vector<8x8xf32>
    %64 = arith.subf %60, %63 : vector<8x8xf32>
    %65 = math.exp %64 : vector<8x8xf32>
    %cst_30 = arith.constant dense<0.000000e+00> : vector<8xf32>
    %66 = vector.multi_reduction <add>, %65, %cst_30 [1] : vector<8x8xf32> to vector<8xf32>
    %67 = vector.shape_cast %66 : vector<8xf32> to vector<8x1xf32>
    %68 = tpu.reciprocal %67 {approx = true} : vector<8x1xf32> -> vector<8x1xf32>
    %69 = vector.broadcast %68 : vector<8x1xf32> to vector<8x8xf32>
    %70 = arith.mulf %65, %69 : vector<8x8xf32>
    %cst_31 = arith.constant dense<0.000000e+00> : vector<8x32xf32>
    %71 = tpu.matmul %70, %57, %cst_31 {dimension_numbers = #tpu.dot_dimension_numbers<[1], [0], [0], [1], [0, 0, 1, 1], [], []>} : vector<8x8xf32>, vector<8x32xf32>, vector<8x32xf32> -> vector<8x32xf32>
    %72 = vector.extract_strided_slice %54 {offsets = [0, 96], sizes = [8, 32], strides = [1, 1]} : vector<8x192xf32> to vector<8x32xf32>
    %73 = vector.extract_strided_slice %54 {offsets = [0, 128], sizes = [8, 32], strides = [1, 1]} : vector<8x192xf32> to vector<8x32xf32>
    %74 = vector.extract_strided_slice %54 {offsets = [0, 160], sizes = [8, 32], strides = [1, 1]} : vector<8x192xf32> to vector<8x32xf32>
    %cst_32 = arith.constant dense<0.000000e+00> : vector<8x8xf32>
    %75 = tpu.matmul %72, %73, %cst_32 {dimension_numbers = #tpu.dot_dimension_numbers<[1], [1], [0], [0], [0, 0, 1, 0], [], []>} : vector<8x32xf32>, vector<8x32xf32>, vector<8x8xf32> -> vector<8x8xf32>
    %cst_33 = arith.constant 0.377964467 : f32
    %76 = vector.broadcast %cst_33 : f32 to vector<8x8xf32>
    %77 = arith.mulf %75, %76 : vector<8x8xf32>
    %cst_34 = arith.constant dense<0xFF800000> : vector<8xf32>
    %78 = vector.multi_reduction <maximumf>, %77, %cst_34 [1] : vector<8x8xf32> to vector<8xf32>
    %79 = vector.shape_cast %78 : vector<8xf32> to vector<8x1xf32>
    %80 = vector.broadcast %79 : vector<8x1xf32> to vector<8x8xf32>
    %81 = arith.subf %77, %80 : vector<8x8xf32>
    %82 = math.exp %81 : vector<8x8xf32>
    %cst_35 = arith.constant dense<0.000000e+00> : vector<8xf32>
    %83 = vector.multi_reduction <add>, %82, %cst_35 [1] : vector<8x8xf32> to vector<8xf32>
    %84 = vector.shape_cast %83 : vector<8xf32> to vector<8x1xf32>
    %85 = tpu.reciprocal %84 {approx = true} : vector<8x1xf32> -> vector<8x1xf32>
    %86 = vector.broadcast %85 : vector<8x1xf32> to vector<8x8xf32>
    %87 = arith.mulf %82, %86 : vector<8x8xf32>
    %cst_36 = arith.constant dense<0.000000e+00> : vector<8x32xf32>
    %88 = tpu.matmul %87, %74, %cst_36 {dimension_numbers = #tpu.dot_dimension_numbers<[1], [0], [0], [1], [0, 0, 1, 1], [], []>} : vector<8x8xf32>, vector<8x32xf32>, vector<8x32xf32> -> vector<8x32xf32>
    %89 = tpu.concatenate %71, %88 in 0 : vector<8x32xf32>, vector<8x32xf32> -> vector<16x32xf32>
    %cst_37 = arith.constant dense<0.000000e+00> : vector<8x32xf32>
    %90 = tpu.matmul %2, %89, %cst_37 {dimension_numbers = #tpu.dot_dimension_numbers<[1], [0], [0], [1], [0, 0, 1, 1], [], []>} : vector<8x16xf32>, vector<16x32xf32>, vector<8x32xf32> -> vector<8x32xf32>
    %91 = vector.broadcast %3 : vector<8x1xf32> to vector<8x32xf32>
    %92 = arith.addf %90, %91 : vector<8x32xf32>
    %c1_38 = arith.constant 1 : index
    %c0_39 = arith.constant 0 : index
    %c0_40 = arith.constant 0 : index
    %93 = vector.load %arg5[%c1_38, %c0_39, %c0_40] : memref<2x8x32xf32, #tpu.memory_space<vmem>>, vector<1x8x32xf32>
    %94 = vector.shape_cast %93 : vector<1x8x32xf32> to vector<8x32xf32>
    %95 = vector.shape_cast %92 : vector<8x32xf32> to vector<1x8x32xf32>
    tpu.vector_store %arg5[%c1_38, %c0_39, %c0_40], %95 {strides = array<i32>} : memref<2x8x32xf32, #tpu.memory_space<vmem>>, vector<1x8x32xf32>,
    return
  }
}

</mosaic_0001>

<bundles_post_ra>
// kernel: tpu_custom_call.1
= control target key start
LH: loop header
LB: loop body
LE: loop exit
PB: predicated region body
PF: predicated region fallthrough
CT: control target
= control target key end

     0   :  { %10 = vsyncpa [#allocation3], 0  ;;  %s761_s0 = inlined_call_operand.hbm [shape: f32[2,8,32], index: 0, kind: input, shape index: {}]   ;;  %s762_s1 = inlined_call_operand.hbm [shape: f32[32,192], index: 1, kind: input, shape index: {}]   ;;  %s763_s2 = inlined_call_operand.hbm [shape: f32[1,192], index: 2, kind: input, shape index: {}]   ;;  %s764_s3 = inlined_call_operand.vmem [shape: f32[8,16], index: 3, kind: input, shape index: {}]   ;;  %s765_s4 = inlined_call_operand.vmem [shape: f32[8,1], index: 4, kind: input, shape index: {}]   ;;  %s766_s5 = inlined_call_operand.hbm [shape: f32[2,8,32], index: 5, kind: output, shape index: {}]  }
   0x1   :  { %11 = vsyncpa [#allocation6], 0  ;;  %s30_s20 = sshll.u32 %s762_s1, 4  ;;  %s31_s20 = int_to_ptr.hbm [resolvable:$true] %s30_s20 }
   0x2   :  { %12 = vsyncpa [#allocation4], 0  ;;  %s655_s21 = smov [#allocation5]   ;;  %s17_s25 = sshll.u32 %s761_s0, 4  ;;  %s18_s25 = int_to_ptr.hbm [resolvable:$true] %s17_s25 }
   0x3   :  { %s32_s22 = sshll.u32 %s655_s21, 4  ;;  %s656_s26 = smov 256   ;;  %s33_s22 = int_to_ptr.vmem [resolvable:$true] %s32_s22 }
   0x4   :  { %s657_s27 = smov 16   ;;  %s658_s28 = smov [#allocation2]  }
   0x5   :  { %38 = dma.hbm_to_vmem [thread:$0]  %s31_s20, 1024, %s33_s22, [#allocation6], %s656_s26, %s656_s26, %s657_s27  }
   0x6   :  { %s19_s29 = sshll.u32 %s658_s28, 4  ;;  %s659_s30 = smov 128   ;;  %s20_s29 = int_to_ptr.vmem [resolvable:$true] %s19_s29 }
   0x7   :  { %s660_s6 = smov 8   ;;  %s44_s8 = sshll.u32 %s763_s2, 4  ;;  %s45_s8 = int_to_ptr.hbm [resolvable:$true] %s44_s8 }
   0x8   :  { %25 = dma.hbm_to_vmem [thread:$0]  %s18_s25, 256, %s20_s29, [#allocation3], %s659_s30, %s659_s30, %s660_s6  }
   0x9   :  { %s661_s9 = smov [#allocation7]  }
   0xa   :  { %s46_s0 = sshll.u32 %s661_s9, 4  ;;  %s47_s0 = int_to_ptr.vmem [resolvable:$true] %s46_s0 }
   0xb   :  { %49 = dma.hbm_to_vmem [thread:$0]  %s45_s8, 32, %s47_s0, [#allocation6]  }
   0xc   :  { %649 = dma.done.wait [#allocation3], 256  }
   0xd   :  { %650 = vsyncadd [#allocation3], 4294967040 }
   0xe   :  { %651 = dma.done.wait [#allocation6], 1056  }
   0xf   :  { %652 = vsyncadd [#allocation6], 4294966240  ;;  %v72_v0 = vld [vmem:[#allocation5 + $0x30] sm:$0xff]  ;;  %v70_v1 = vld [vmem:[#allocation5 + $0x20] sm:$0xff]  ;;  %vm83_vm0 = vcmask 261120   ;;  %s662_s2 = smov 32  }
  0x10   :  { %99 = vmatpush.msra.mxu0 %v72_v0  ;;  %v68_v2 = vld [vmem:[#allocation5 + $0x10] sm:$0xff]  ;;  %v66_v3 = vld [vmem:[#allocation5] sm:$0xff]  ;;  %s663_s10 = smov 96   ;;  %vm155_vm1 = vcmask 64512   ;;  %v73_v13 = vld [vmem:[#allocation5 + $0x38] sm:$0xff]  ;;  %s664_s11 = smov 64  }
  0x11   :  { %v77_v4 = vld [vmem:[#allocation2] sm:$0xff]  ;;  %v710_v5 = vld [vmem:[#allocation7] sm:$0x3]  ;;  %v71_v14 = vld [vmem:[#allocation5 + $0x28] sm:$0xff]  ;;  %119 = vmatpush.msra.mxu1 %v73_v13  ;;  %vm263_vm2 = vcmask 130048   ;;  %s491_s18 = sshll.u32 %s766_s5, 4  ;;  %s492_s18 = int_to_ptr.hbm [resolvable:$true] %s491_s18 }
  0x12   :  { %100 = vmatpush.msra.mxu0 %v70_v1  ;;  %v79_v6 = vperm.slane %v710_v5, 0  ;;  %v69_v15 = vld [vmem:[#allocation5 + $0x18] sm:$0xff]  ;;  %v67_v16 = vld [vmem:[#allocation5 + $0x8] sm:$0xff]  ;;  %v80_v27 = vperm.slane %v710_v5, 1  ;;  %v76_v5 = vld [vmem:[%s765_s4] sm:$0xff] }
  0x13   :  { %120 = vmatpush.msra.mxu1 %v71_v14  ;;  %v289_v20 = vld [vmem:[#allocation2 + $0x8] sm:$0xff] }
  0x14   :  { %101 = vmatpush.msra.mxu0 %v68_v2 }
  0x15   :  { %121 = vmatpush.msra.mxu1 %v69_v15 }
  0x16   :  { %102 = vmatpush.msra.mxu0 %v66_v3 }
  0x17   :  { %505 = vmatmul.msk.f32.vlgmr.msra.gmra.mxu0 %vm83_vm0, %v77_v4  ;;  %122 = vmatpush.msra.mxu1 %v67_v16 }
  0x18   :  { %506 = vmatmul.msk.f32.vlgmr.msra.gmra.mxu1 %vm83_vm0, %v77_v4  ;;  %v75_v4 = vld [vmem:[%s764_s3] sm:$0xff]  ;;  %s666_s3 = smov [#allocation8]  }
  0x19   :  { %305 = vmatpush.msrb.mxu1 %v72_v0  ;;  %s489_s4 = sshll.u32 %s666_s3, 4  ;;  %s490_s4 = int_to_ptr.vmem [resolvable:$true] %s489_s4 }
  0x1b   :  { %306 = vmatpush.msrb.mxu1 %v70_v1 }
  0x1d   :  { %307 = vmatpush.msrb.mxu1 %v68_v2 }
  0x1f   :  { %308 = vmatpush.msrb.mxu1 %v66_v3 }
  0x20   :  { %514 = vmatmul.msk.f32.vlgmr.msrb.gmra.mxu1 %vm83_vm0, %v289_v20 }
  0x94   :  { %v104_v7 = vpop.f32.mrf.mxu0 }
  0x95   :  { %v105_v8 = vadd.f32 %v104_v7, %v79_v6  ;;  %v124_v23 = vpop.f32.mrf.mxu1 }
  0x96   :  { %v125_v29 = vadd.f32 %v124_v23, %v80_v27 }
  0x97   :  { %193 = vrot.lane.b32.xlu2 %v105_v8, %s662_s2  ;;  %128 = vrot.lane.b32.xlu0 %v105_v8, %s663_s10 }
  0x9d   :  { %v310_v24 = vpop.f32.mrf.mxu1 }
  0x9e   :  { %v311_v25 = vadd.f32 %v310_v24, %v79_v6  ;;  %v665_v6 = vmov 0  }
  0x9f   :  { %535 = vset.pattern.permute.xlu1 %v665_v6  ;;  %536 = vset.pattern.permute.xlu0 %v665_v6 }
  0xf1   :  { %v194_v32 = vpop.permute.xlu2 %193 }
 0x109   :  { %v129_v9 = vpop.permute.xlu0 %128 }
 0x10a   :  { %507 = vmatpush.xpose.msk.msra.mxu2 %vm83_vm0, %v129_v9 }
 0x10d   :  { %508 = vmatmul.msk.f32.vlgmr.msra.gmra.mxu2 %vm83_vm0, %v105_v8 }
 0x190   :  { %v151_v10 = vpop.f32.mrf.mxu2 }
 0x191   :  { %v154_v11 = vmul.f32 0.37796447, %v151_v10 }
 0x193   :  { %v156_v12 = vsel %vm155_vm1, %v154_v11, -inf }
 0x194   :  { %157 = vmax.xlane.f32.xlu0 %v156_v12 }
 0x1a8   :  { %334 = vrot.lane.b32.xlu0 %v311_v25, %s663_s10 }
 0x1b0   :  { %398 = vrot.lane.b32.xlu0 %v311_v25, %s662_s2 }
 0x207   :  { %v158_v17 = vpop.xlane.xlu0 %157 }
 0x208   :  { %v159_v18 = vsub.f32 %v154_v11, %v158_v17 }
 0x20a   :  { %v160_v19 = vmul.f32 1.442695, %v159_v18 }
 0x20c   :  { %537 = vpow2.f32 %v160_v19 }
 0x212   :  { %v538_v21 = vpop.eup %537 }
 0x213   :  { %v162_v22 = vsel %vm155_vm1, %v538_v21, 0.0 }
 0x214   :  { %163 = vadd.xlane.f32.xlu1 %v162_v22 }
 0x21a   :  { %v335_v36 = vpop.permute.xlu0 %334 }
 0x222   :  { %v399_v40 = vpop.permute.xlu0 %398 }
 0x22d   :  { %167 = vrot.lane.b32.xlu1 %v105_v8, %s664_s11 }
 0x287   :  { %v164_v26 = vpop.xlane.xlu1 %163 }
 0x288   :  { %539 = vrcp.f32 %v164_v26 }
 0x28e   :  { %v540_v28 = vpop.eup %539 }
 0x28f   :  { %v166_v31 = vmul.f32 %v540_v28, %v538_v21 }
 0x29f   :  { %v168_v30 = vpop.permute.xlu1 %167 }
 0x2a0   :  { %188 = vmatpush.msra.mxu3 %v168_v30 }
 0x2a1   :  { %509 = vmatmul.msk.f32.vlgmr.msra.gmra.mxu3 %vm155_vm1, %v166_v31 }
 0x2a2   :  { %510 = vmatpush.xpose.msk.msrb.mxu3 %vm83_vm0, %v125_v29 }
 0x2a6   :  { %325 = vmatpush.msra.mxu3 %v73_v13 }
 0x2a8   :  { %326 = vmatpush.msra.mxu3 %v71_v14 }
 0x2a9   :  { %511 = vmatmul.msk.f32.vlgmr.msrb.gmra.mxu3 %vm83_vm0, %v194_v32 }
 0x2aa   :  { %327 = vmatpush.msra.mxu3 %v69_v15 }
 0x2ac   :  { %328 = vmatpush.msra.mxu3 %v67_v16 }
 0x2b1   :  { %515 = vmatmul.msk.f32.vlgmr.msra.gmra.mxu3 %vm83_vm0, %v289_v20 }
 0x324   :  { %v190_v33 = vpop.f32.mrf.mxu3 }
 0x32c   :  { %v217_v34 = vpop.f32.mrf.mxu3 }
 0x32d   :  { %v220_v35 = vmul.f32 0.37796447, %v217_v34 }
 0x32f   :  { %v221_v37 = vsel %vm155_vm1, %v220_v35, -inf }
 0x330   :  { %222 = vmax.xlane.f32.xlu2 %v221_v37 }
 0x334   :  { %v330_v38 = vpop.f32.mrf.mxu3 }
 0x335   :  { %v331_v39 = vadd.f32 %v330_v38, %v80_v27 }
 0x337   :  { %519 = vmatpush.xpose.msk.msra.mxu1 %vm83_vm0, %v331_v39 }
 0x33a   :  { %520 = vmatmul.msk.f32.vlgmr.msra.gmra.mxu1 %vm83_vm0, %v399_v40 }
 0x348   :  { %232 = vrot.lane.b32.xlu2 %v125_v29, %s663_s10 }
 0x3a3   :  { %v223_v41 = vpop.xlane.xlu2 %222 }
 0x3a4   :  { %v224_v42 = vsub.f32 %v220_v35, %v223_v41 }
 0x3a6   :  { %v225_v43 = vmul.f32 1.442695, %v224_v42 }
 0x3a8   :  { %541 = vpow2.f32 %v225_v43 }
 0x3ab   :  { %v233_v44 = vpop.permute.xlu2 %232 }
 0x3ac   :  { %253 = vmatpush.msrb.mxu2 %v233_v44 }
 0x3ae   :  { %516 = vmatpush.xpose.msk.msra.mxu2 %vm83_vm0, %v335_v36  ;;  %v542_v45 = vpop.eup %541 }
 0x3af   :  { %v227_v46 = vsel %vm155_vm1, %v542_v45, 0.0 }
 0x3b0   :  { %228 = vadd.xlane.f32.xlu1 %v227_v46 }
 0x3b7   :  { %v422_v47 = vpop.f32.mrf.mxu1 }
 0x3b8   :  { %v425_v48 = vmul.f32 0.37796447, %v422_v47 }
 0x3ba   :  { %v426_v49 = vsel %vm155_vm1, %v425_v48, -inf }
 0x3bb   :  { %427 = vmax.xlane.f32.xlu2 %v426_v49 }
 0x3d3   :  { %372 = vrot.lane.b32.xlu2 %v311_v25, %s664_s11 }
 0x423   :  { %v229_v50 = vpop.xlane.xlu1 %228 }
 0x424   :  { %543 = vrcp.f32 %v229_v50 }
 0x42a   :  { %v544_v51 = vpop.eup %543 }
 0x42b   :  { %v231_v52 = vmul.f32 %v544_v51, %v542_v45 }
 0x42d   :  { %512 = vmatmul.msk.f32.vlgmr.msrb.gmra.mxu2 %vm155_vm1, %v231_v52 }
 0x42e   :  { %v428_v53 = vpop.xlane.xlu2 %427 }
 0x42f   :  { %v429_v54 = vsub.f32 %v425_v48, %v428_v53 }
 0x431   :  { %v430_v55 = vmul.f32 1.442695, %v429_v54 }
 0x433   :  { %545 = vpow2.f32 %v430_v55 }
 0x435   :  { %517 = vmatmul.msk.f32.vlgmr.msra.gmra.mxu2 %vm83_vm0, %v311_v25 }
 0x436   :  { %v373_v59 = vpop.permute.xlu2 %372 }
 0x439   :  { %v546_v56 = vpop.eup %545 }
 0x43a   :  { %v432_v57 = vsel %vm155_vm1, %v546_v56, 0.0 }
 0x43b   :  { %433 = vadd.xlane.f32.xlu0 %v432_v57 }
 0x4ae   :  { %v434_v10 = vpop.xlane.xlu0 %433 }
 0x4b0   :  { %v255_v58 = vpop.f32.mrf.mxu2 }
 0x4b1   :  { %281 = vmatpush.msrb.mxu0 %v255_v58 }
 0x4b3   :  { %282 = vmatpush.msrb.mxu0 %v190_v33 }
 0x4b4   :  { %513 = vmatmul.msk.f32.vlgmr.msrb.gmra.mxu0 %vm263_vm2, %v75_v4 }
 0x4b5   :  { %393 = vmatpush.msra.mxu0 %v373_v59 }
 0x4b8   :  { %v357_v60 = vpop.f32.mrf.mxu2 }
 0x4b9   :  { %v360_v61 = vmul.f32 0.37796447, %v357_v60 }
 0x4bb   :  { %v361_v62 = vsel %vm155_vm1, %v360_v61, -inf }
 0x4bc   :  { %362 = vmax.xlane.f32.xlu1 %v361_v62 }
 0x52f   :  { %v363_v63 = vpop.xlane.xlu1 %362 }
 0x530   :  { %v364_v0 = vsub.f32 %v360_v61, %v363_v63 }
 0x531   :  { %v284_v14 = vpop.f32.mrf.mxu0 }
 0x532   :  { %v365_v1 = vmul.f32 1.442695, %v364_v0 }
 0x534   :  { %547 = vpow2.f32 %v365_v1 }
 0x53a   :  { %v548_v2 = vpop.eup %547 }
 0x53b   :  { %v367_v3 = vsel %vm155_vm1, %v548_v2, 0.0 }
 0x53c   :  { %368 = vadd.xlane.f32.xlu1 %v367_v3 }
 0x555   :  { %437 = vrot.lane.b32.xlu1 %v331_v39, %s663_s10 }
 0x55d   :  { %260 = vperm.xlu1 %535, %v76_v5  }
 0x5af   :  { %v369_v7 = vpop.xlane.xlu1 %368 }
 0x5b0   :  { %549 = vrcp.f32 %v369_v7 }
 0x5b1   :  { %551 = vrcp.f32 %v434_v10 }
 0x5b6   :  { %v550_v8 = vpop.eup %549 }
 0x5b7   :  { %v371_v9 = vmul.f32 %v550_v8, %v548_v2  ;;  %v552_v11 = vpop.eup %551 }
 0x5b8   :  { %v436_v12 = vmul.f32 %v552_v11, %v546_v56 }
 0x5b9   :  { %518 = vmatmul.msk.f32.vlgmr.msra.gmra.mxu0 %vm155_vm1, %v371_v9 }
 0x5c7   :  { %v438_v13 = vpop.permute.xlu1 %437 }
 0x5c8   :  { %458 = vmatpush.msrb.mxu3 %v438_v13 }
 0x5c9   :  { %521 = vmatmul.msk.f32.vlgmr.msrb.gmra.mxu3 %vm155_vm1, %v436_v12 }
 0x5cf   :  { %v261_v15 = vpop.permute.xlu1 %260 }
 0x5d0   :  { %v285_v16 = vadd.f32 %v284_v14, %v261_v15 }
 0x5d2   :  { %287 = vst.msk [vmem:[#allocation8] sm:$0xff] %vm83_vm0, %v285_v16 }
 0x636   :  { %v395_v18 = vpop.f32.mrf.mxu0 }
 0x64c   :  { %v460_v17 = vpop.f32.mrf.mxu3 }
 0x64d   :  { %477 = vmatpush.msrb.mxu2 %v460_v17 }
 0x64f   :  { %478 = vmatpush.msrb.mxu2 %v395_v18 }
 0x650   :  { %522 = vmatmul.msk.f32.vlgmr.msrb.gmra.mxu2 %vm263_vm2, %v75_v4 }
 0x6d3   :  { %v480_v19 = vpop.f32.mrf.mxu2 }
 0x6d4   :  { %v481_v20 = vadd.f32 %v480_v19, %v261_v15 }
 0x6d6   :  { %484 = vst.msk [vmem:[#allocation8 + $0x8] sm:$0xff] %vm83_vm0, %v481_v20 }
 0x6d7   :  { %497 = dma.vmem_to_hbm [thread:$0]  %s490_s4, 256, %s492_s18, [#allocation4], %s659_s30, %s659_s30, %s660_s6  }
 0x6d8   :  { %653 = dma.done.wait [#allocation4], 256  }
 0x6d9   :  { %654 = vsyncadd [#allocation4], 4294967040 }
 0x6da   :  { %502 = vsyncpa [#allocation3], 1 }
 0x6db   :  { %503 = vsyncpa [#allocation6], 1 }
 0x6dc   :  { %504 = vsyncpa [#allocation4], 1 }

</bundles_post_ra>
